<compile_context>
chip_gen: v7x
topology: tpu7x:2x2x1
jax: 0.10.0
libtpu: 0.0.40
codegen_flags: <defaults>
</compile_context>

<pallas_src>
import jax
import jax.numpy as jnp
from jax.experimental import pallas as pl
from jax.experimental.pallas import tpu as pltpu


def _round_up(x: int, m: int) -> int:
    return (x + m - 1) // m * m


def _serialized_embedding_kernel(idx_ref, tab_ref, out_ref, acc_ref):
    # idx_ref : (TM, 1)  int32    -- full-vocab token ids for this token tile
    # tab_ref : (KT, Hp)           -- current vocab tile of the (padded) table
    # out_ref : (TM, Hp)           -- output tile (written on last vocab step)
    # acc_ref : (TM, Hp) f32 VMEM  -- accumulator, resident across vocab axis
    v = pl.program_id(1)
    kt = tab_ref.shape[0]

    idx = idx_ref[...]                                    # (TM, 1) int32
    local = idx - v * kt                                  # chunk-local ids

    # Equality against an iota implies both (local >= 0) and (local < kt),
    # i.e. the explicit mask of the PyTorch module; out-of-range or padded
    # (-1) ids produce an all-zero one-hot row -- same as the masked sum.
    row_iota = jax.lax.broadcasted_iota(jnp.int32, (idx.shape[0], kt), 1)
    onehot = (local == row_iota).astype(tab_ref.dtype)    # (TM, KT), exact 0/1

    x = jnp.dot(onehot, tab_ref[...], preferred_element_type=jnp.float32)

    @pl.when(v == 0)
    def _():
        acc_ref[...] = x                                  # no zero-fill + RMW

    @pl.when(v > 0)
    def _():
        acc_ref[...] += x

    @pl.when(v == pl.num_programs(1) - 1)
    def _():
        out_ref[...] = acc_ref[...].astype(out_ref.dtype)


def serialized_embedding(indices, weight, serialization_factor,
                         *, tm=256, kt=512, table_dtype=None):
    """JAX wrapper reproducing SerializedEmbedding.forward.

    table_dtype: optionally stream the table in a narrower dtype (e.g.
    jnp.bfloat16) with f32 accumulation; output stays in weight.dtype.
    """
    V, H = weight.shape
    assert V % serialization_factor == 0                  # module contract
    out_dtype = weight.dtype

    tab = weight if table_dtype is None else weight.astype(table_dtype)

    # ---- tile / padding choices (8-sublane, 128-lane aligned) ----
    tm = min(tm, _round_up(int(indices.size), 8))         # token tile
    kt = min(kt, _round_up(V, 8))                         # vocab tile (reduction)
    h_pad = _round_up(H, 128)                             # lane-dense output
    T = int(indices.size)
    T_pad = _round_up(T, tm)
    V_pad = _round_up(V, kt)

    if (V_pad, h_pad) != (V, H):
        tab = jnp.pad(tab, ((0, V_pad - V), (0, h_pad - H)))

    flat = indices.reshape(-1).astype(jnp.int32)
    if T_pad > T:
        flat = jnp.concatenate(
            [flat, jnp.full((T_pad - T,), -1, dtype=jnp.int32)])
    idx2d = flat.reshape(T_pad, 1)

    n_t = T_pad // tm
    n_v = V_pad // kt

    # ---- VMEM budget: table tile (x2 buf) + idx (x2) + out tile (x2) + acc + one-hot ----
    tab_item = jnp.dtype(tab.dtype).itemsize
    out_item = jnp.dtype(out_dtype).itemsize
    need = (2 * kt * h_pad * tab_item
            + 2 * tm * 4
            + 2 * tm * h_pad * out_item
            + tm * h_pad * 4
            + tm * kt * 4)
    vmem_limit = int(min(max(4 * need, 16 * 2**20), 48 * 2**20))

    cost = pl.CostEstimate(
        flops=2 * T_pad * V_pad * h_pad,
        transcendentals=0,
        bytes_accessed=(n_t * V_pad * h_pad * tab_item
                        + T_pad * 4
                        + T_pad * h_pad * out_item))

    out = pl.pallas_call(
        _serialized_embedding_kernel,
        out_shape=jax.ShapeDtypeStruct((T_pad, h_pad), out_dtype),
        grid_spec=pltpu.PrefetchScalarGridSpec(
            num_scalar_prefetch=0,
            grid=(n_t, n_v),                               # reduction axis last
            in_specs=[
                pl.BlockSpec((tm, 1), lambda t, v: (t, 0)),       # token ids
                pl.BlockSpec((kt, h_pad), lambda t, v: (v, 0)),   # table tile
            ],
            out_specs=pl.BlockSpec((tm, h_pad), lambda t, v: (t, 0)),
            scratch_shapes=[pltpu.VMEM((tm, h_pad), jnp.float32)],
        ),
        compiler_params=pltpu.CompilerParams(
            dimension_semantics=("parallel", "arbitrary"),
            vmem_limit_bytes=vmem_limit),
        cost_estimate=cost,
    )(idx2d, tab)

    return out[:T, :H].reshape(*indices.shape, H)


if __name__ == "__main__":
    key = jax.random.PRNGKey(0)
    k_w, k_idx = jax.random.split(key)

    # small shapes consistent with the module
    vocab = 64
    hidden = 32
    serialization_factor = 4
    batch, seq = 2, 8

    weight = jax.random.normal(k_w, (vocab, hidden), dtype=jnp.float32)
    indices = jax.random.randint(k_idx, (batch, seq), 0, vocab, dtype=jnp.int32)

    # f32 path: exact vs. plain embedding lookup
    out = serialized_embedding(indices, weight, serialization_factor)
    out = jax.block_until_ready(out)
    ref = jnp.take(weight, indices.reshape(-1), axis=0).reshape(batch, seq, hidden)
    assert out.shape == (batch, seq, hidden)
    assert jnp.allclose(out, ref, atol=1e-5, rtol=1e-5), "f32 mismatch vs reference"

    # bf16-streamed table (fast path): the 0/1 one-hot is exact in bf16, so
    # this equals a lookup into the bf16-rounded table.
    out_bf = serialized_embedding(indices, weight, serialization_factor,
                                  table_dtype=jnp.bfloat16)
    out_bf = jax.block_until_ready(out_bf)
    ref_bf = jnp.take(weight.astype(jnp.bfloat16), indices.reshape(-1), axis=0
                      ).astype(jnp.float32).reshape(batch, seq, hidden)
    assert jnp.allclose(out_bf, ref_bf, atol=1e-5, rtol=1e-5), "bf16 mismatch vs reference"

    print("KERNEL_OK")
</pallas_src>

<mosaic_0001>
module attributes {stable_mosaic.version = 11 : i64} {
  func.func @_serialized_embedding_kernel(%arg0: i32, %arg1: i32, %arg2: memref<16x1xi32, #tpu.memory_space<vmem>>, %arg3: memref<64x128xf32, #tpu.memory_space<vmem>>, %arg4: memref<16x128xf32, #tpu.memory_space<vmem>>, %arg5: memref<16x128xf32, #tpu.memory_space<vmem>>) attributes {dimension_semantics = [#tpu.dimension_semantics<parallel>, #tpu.dimension_semantics<arbitrary>], iteration_bounds = array<i64: 1, 1>, scalar_prefetch = 0 : i64, scratch_operands = 1 : i64, tpu.core_type = #tpu.core_type<tc>, window_params = [{transform_indices = @transform_0, window_bounds = array<i64: 16, 1>}, {transform_indices = @transform_1, window_bounds = array<i64: 64, 128>}, {transform_indices = @transform_2, window_bounds = array<i64: 16, 128>}]} {
    %c0 = arith.constant 0 : index
    %c0_0 = arith.constant 0 : index
    %0 = vector.load %arg2[%c0, %c0_0] : memref<16x1xi32, #tpu.memory_space<vmem>>, vector<16x1xi32>
    %c64_i32 = arith.constant 64 : i32
    %1 = arith.muli %arg1, %c64_i32 : i32
    %2 = vector.broadcast %1 : i32 to vector<16x1xi32>
    %3 = arith.subi %0, %2 : vector<16x1xi32>
    %4 = tpu.iota {dimensions = array<i32: 1>} : vector<16x64xi32>
    %5 = vector.broadcast %3 : vector<16x1xi32> to vector<16x64xi32>
    %6 = arith.cmpi eq, %5, %4 : vector<16x64xi32>
    %7 = arith.extui %6 : vector<16x64xi1> to vector<16x64xi32>
    %8 = arith.sitofp %7 : vector<16x64xi32> to vector<16x64xf32>
    %c0_1 = arith.constant 0 : index
    %c0_2 = arith.constant 0 : index
    %9 = vector.load %arg3[%c0_1, %c0_2] : memref<64x128xf32, #tpu.memory_space<vmem>>, vector<64x128xf32>
    %cst = arith.constant dense<0.000000e+00> : vector<16x128xf32>
    %10 = tpu.matmul %8, %9, %cst {dimension_numbers = #tpu.dot_dimension_numbers<[1], [0], [0], [1], [0, 0, 1, 1], [], []>} : vector<16x64xf32>, vector<64x128xf32>, vector<16x128xf32> -> vector<16x128xf32>
    %c0_i32 = arith.constant 0 : i32
    %11 = arith.cmpi eq, %arg1, %c0_i32 : i32
    %12 = arith.extui %11 : i1 to i32
    %c0_i32_3 = arith.constant 0 : i32
    %13 = arith.cmpi ne, %12, %c0_i32_3 : i32
    scf.if %13 {
      %c0_8 = arith.constant 0 : index
      %c0_9 = arith.constant 0 : index
      %20 = vector.load %arg5[%c0_8, %c0_9] : memref<16x128xf32, #tpu.memory_space<vmem>>, vector<16x128xf32>
      tpu.vector_store %arg5[%c0_8, %c0_9], %10 {strides = array<i32>} : memref<16x128xf32, #tpu.memory_space<vmem>>, vector<16x128xf32>,
    } else {
    }
    %c0_i32_4 = arith.constant 0 : i32
    %14 = arith.cmpi sgt, %arg1, %c0_i32_4 : i32
    %15 = arith.extui %14 : i1 to i32
    %c0_i32_5 = arith.constant 0 : i32
    %16 = arith.cmpi ne, %15, %c0_i32_5 : i32
    scf.if %16 {
      %c0_8 = arith.constant 0 : index
      %c0_9 = arith.constant 0 : index
      %20 = vector.load %arg5[%c0_8, %c0_9] : memref<16x128xf32, #tpu.memory_space<vmem>>, vector<16x128xf32>
      %21 = arith.addf %20, %10 : vector<16x128xf32>
      %c0_10 = arith.constant 0 : index
      %c0_11 = arith.constant 0 : index
      %22 = vector.load %arg5[%c0_10, %c0_11] : memref<16x128xf32, #tpu.memory_space<vmem>>, vector<16x128xf32>
      tpu.vector_store %arg5[%c0_10, %c0_11], %21 {strides = array<i32>} : memref<16x128xf32, #tpu.memory_space<vmem>>, vector<16x128xf32>,
    } else {
    }
    %c0_i32_6 = arith.constant 0 : i32
    %17 = arith.cmpi eq, %arg1, %c0_i32_6 : i32
    %18 = arith.extui %17 : i1 to i32
    %c0_i32_7 = arith.constant 0 : i32
    %19 = arith.cmpi ne, %18, %c0_i32_7 : i32
    scf.if %19 {
      %c0_8 = arith.constant 0 : index
      %c0_9 = arith.constant 0 : index
      %20 = vector.load %arg5[%c0_8, %c0_9] : memref<16x128xf32, #tpu.memory_space<vmem>>, vector<16x128xf32>
      %c0_10 = arith.constant 0 : index
      %c0_11 = arith.constant 0 : index
      %21 = vector.load %arg4[%c0_10, %c0_11] : memref<16x128xf32, #tpu.memory_space<vmem>>, vector<16x128xf32>
      tpu.vector_store %arg4[%c0_10, %c0_11], %20 {strides = array<i32>} : memref<16x128xf32, #tpu.memory_space<vmem>>, vector<16x128xf32>,
    } else {
    }
    return
  }
  func.func @transform_0(%arg0: i32, %arg1: i32) -> (i32, i32) {
    %c0_i32 = arith.constant 0 : i32
    %c0_i32_0 = arith.constant 0 : i32
    return %arg0, %c0_i32 : i32, i32
  }
  func.func @transform_1(%arg0: i32, %arg1: i32) -> (i32, i32) {
    %c0_i32 = arith.constant 0 : i32
    %c0_i32_0 = arith.constant 0 : i32
    return %arg1, %c0_i32 : i32, i32
  }
  func.func @transform_2(%arg0: i32, %arg1: i32) -> (i32, i32) {
    %c0_i32 = arith.constant 0 : i32
    %c0_i32_0 = arith.constant 0 : i32
    return %arg0, %c0_i32 : i32, i32
  }
}

</mosaic_0001>

<bundles_post_ra>
// kernel: tpu_custom_call.1
= control target key start
LH: loop header
LB: loop body
LE: loop exit
PB: predicated region body
PF: predicated region fallthrough
CT: control target
= control target key end

     0   :  { %7 = vsyncpa [#allocation4], 0  ;;  %s337_s0 = inlined_call_operand.vmem [shape: s32[16,1], index: 0, kind: input, shape index: {}]   ;;  %s338_s1 = inlined_call_operand.hbm [shape: f32[64,128], index: 1, kind: input, shape index: {}]   ;;  %s339_s2 = inlined_call_operand.hbm [shape: f32[16,128], index: 2, kind: output, shape index: {}]  }
   0x1   :  { %8 = vsyncpa [#allocation5], 0  ;;  %s280_s9 = smov [#allocation3]   ;;  %s232_s13 = scalar_lea.hbm %s338_s1, 1024 }
   0x2   :  { %s16_s10 = sshll.u32 %s280_s9, 4  ;;  %p233_p0 = scmp.ne.s32.totalorder %s338_s1, %s232_s13  ;;  %s17_s10 = int_to_ptr.vmem [resolvable:$true] %s16_s10 }
   0x3   :  { %p236_p1 = scmp.lt.u32.totalorder %s232_s13, %s338_s1 }
   0x5   :  { %p238_p2 = pnand %p236_p1, %p233_p0 }
   0x7   :  { %241 = shalt.err (!%p238_p2)
}
   0x8   :  { %s242_s18 = scalar_lea.vmem %s17_s10, 1024  ;;  %p247_p4 = scmp.lt.s32.totalorder %s17_s10, %s17_s10 }
   0x9   :  { %p243_p3 = scmp.ne.s32.totalorder %s17_s10, %s242_s18  ;;  %p248_p5 = scmp.lt.s32.totalorder %s242_s18, %s242_s18 }
   0xb   :  { %p249_p6 = por %p248_p5, %p247_p4 }
   0xd   :  { %p250_p7 = pnand %p249_p6, %p243_p3 }
   0xf   :  { %253 = shalt.err (!%p250_p7)
}
  0x10   :  { %s281_s19 = smov 128   ;;  %s282_s20 = smov 8  }
  0x11   :  { %22 = dma.hbm_to_vmem [thread:$0]  %s338_s1, 1024, %s17_s10, [#allocation4], %s281_s19, %s281_s19, %s282_s20  }
  0x12   :  { %276 = dma.done.wait [#allocation4], 1024  }
  0x13   :  { %277 = vsyncadd [#allocation4], 4294966272  ;;  %v283_v0 = vmov 0   ;;  %v26_v1 = vld [vmem:[%s337_s0] sm:$0xff]  ;;  %v47_v3 = vld [vmem:[#allocation3 + $0x8] sm:$0xff]  ;;  %v32_v15 = vlaneseq  ;;  %vm54_vm0 = vcmask 523264  }
  0x14   :  { %231 = vset.pattern.permute.xlu0 %v283_v0  ;;  %v46_v2 = vld [vmem:[#allocation3] sm:$0xff]  ;;  %v48_v4 = vld [vmem:[#allocation3 + $0x10] sm:$0xff]  ;;  %v49_v5 = vld [vmem:[#allocation3 + $0x18] sm:$0xff]  ;;  %v284_v18 = vmov 0.0  }
  0x15   :  { %35 = vperm.xlu0 %231, %v26_v1   ;;  %v27_v6 = vld [vmem:[%s337_s0 + $0x8] sm:$0xff]  ;;  %v209_v7 = vpack.c.bf16 %v47_v3, %v46_v2  ;;  %v213_v8 = vpack.c.bf16 %v49_v5, %v48_v4  ;;  %v50_v9 = vld [vmem:[#allocation3 + $0x20] sm:$0xff]  ;;  %v52_v12 = vld [vmem:[#allocation3 + $0x30] sm:$0xff]  ;;  %v33_v16 = vand.u32 127, %v32_v15  ;;  %s285_s0 = smov [#allocation6]  }
  0x16   :  { %v51_v10 = vld [vmem:[#allocation3 + $0x28] sm:$0xff]  ;;  %v53_v13 = vld [vmem:[#allocation3 + $0x38] sm:$0xff]  ;;  %s164_s1 = sshll.u32 %s285_s0, 4  ;;  %s165_s1 = int_to_ptr.vmem [resolvable:$true] %s164_s1 }
  0x17   :  { %210 = vmatprep.subr.bf16.mxu0 %v209_v7  ;;  %v217_v11 = vpack.c.bf16 %v51_v10, %v50_v9  ;;  %v221_v14 = vpack.c.bf16 %v53_v13, %v52_v12  ;;  %s254_s27 = scalar_lea.vmem %s165_s1, 256  ;;  %p259_p9 = scmp.lt.s32.totalorder %s165_s1, %s165_s1 }
  0x18   :  { %212 = vmatpush3.bf16.msra.mxu0 %v209_v7  ;;  %p255_p8 = scmp.ne.s32.totalorder %s165_s1, %s254_s27  ;;  %p260_p10 = scmp.lt.s32.totalorder %s254_s27, %s254_s27 }
  0x19   :  { %38 = vperm.xlu0 %231, %v27_v6   ;;  %214 = vmatprep.subr.bf16.mxu0 %v213_v8 }
  0x1a   :  { %p261_p11 = por %p260_p10, %p259_p9 }
  0x1c   :  { %216 = vmatpush3.bf16.msra.mxu0 %v213_v8  ;;  %p262_p12 = pnand %p261_p11, %p255_p8 }
  0x1d   :  { %218 = vmatprep.subr.bf16.mxu0 %v217_v11 }
  0x20   :  { %220 = vmatpush3.bf16.msra.mxu0 %v217_v11 }
  0x21   :  { %222 = vmatprep.subr.bf16.mxu0 %v221_v14 }
  0x24   :  { %224 = vmatpush3.bf16.msra.mxu0 %v221_v14 }
  0x94   :  { %v36_v17 = vpop.permute.xlu0 %35 }
  0x95   :  { %vm40_vm1 = vcmp.eq.s32.totalorder %v36_v17, %v33_v16 }
  0x96   :  { %v176_v19 = vsel %vm40_vm1, 1.0, %v284_v18 }
  0x97   :  { %206 = vmatprep.mubr.msk.f32.mxu0 %vm54_vm0, %v176_v19 }
  0x98   :  { %v39_v20 = vpop.permute.xlu0 %38 }
  0x99   :  { %vm41_vm2 = vcmp.eq.s32.totalorder %v39_v20, %v33_v16 }
  0x9a   :  { %v177_v21 = vsel %vm41_vm2, 1.0, %v284_v18 }
  0x9b   :  { %207 = vmatmul.mubr.msk.f32.vlgmr.msra.gmra.mrb[0].mxu0 %vm54_vm0, %v177_v21 }
 0x16e   :  { %v208_v22 = vpop.f32.mrb[0].mxu0 }
 0x16f   :  { %158 = vst [vmem:[#allocation6 + $0x8] sm:$0xff] %v208_v22  ;;  %v127_v23 = vpop.f32.mrb[1].mxu0 }
 0x170   :  { %157 = vst [vmem:[#allocation6] sm:$0xff] %v127_v23 }
 0x171   :  { %265 = shalt.err (!%p262_p12)
}
 0x172   :  { %s266_s30 = scalar_lea.hbm %s339_s2, 256 }
 0x173   :  { %p267_p13 = scmp.ne.s32.totalorder %s339_s2, %s266_s30  ;;  %p270_p0 = scmp.lt.u32.totalorder %s266_s30, %s339_s2 }
 0x175   :  { %p272_p1 = pnand %p270_p0, %p267_p13 }
 0x177   :  { %275 = shalt.err (!%p272_p1)
}
 0x178   :  { %170 = dma.vmem_to_hbm [thread:$0]  %s165_s1, 256, %s339_s2, [#allocation5], %s281_s19, %s281_s19, %s282_s20  }
 0x179   :  { %278 = dma.done.wait [#allocation5], 256  }
 0x17a   :  { %279 = vsyncadd [#allocation5], 4294967040 }
 0x17b   :  { %174 = vsyncpa [#allocation4], 1 }
 0x17c   :  { %175 = vsyncpa [#allocation5], 1 }

</bundles_post_ra>
